<compile_context>
chip_gen: v5e
topology: v5e:2x2
jax: 0.10.0
libtpu: 0.0.40
codegen_flags: <defaults>
</compile_context>

<pallas_src>
import jax
import jax.numpy as jnp
from jax.experimental import pallas as pl

# ---------------- model dimensions (small, consistent with the module) -------
N_BATCH = 2
C_IN = 4
H = W = 16
K = 3
PAD = 1
C_OUT = 16              # conv output channels
HID = 32                # fc hidden
EMB = 8                 # embedding dimension
HW = H * W              # 256  (lane-dense; each sample = exactly two 128-lane tiles)
P = C_IN * K * K        # 36   (im2col patch length)
P_PAD = 40              # P rounded up to a multiple of 8; row P is the bias ones-row
C_OUT_A = C_OUT + 1     # 17: extra constant-one conv channel (carries the fc1 bias)
HID_A = HID + 1         # 33: extra constant-one hidden unit (carries the fc2 bias)


# ---------------------------- Pallas kernel ----------------------------------
def _siamese_kernel(patch_ref, w1_ref, w2t_ref, w3t_ref, out_ref):
    """Whole SiameseNet embedding for the fused batch [x1; x2] in one invocation.

    patch_ref : (P_PAD, 2N*HW)  bf16  im2col patches; ones-row at index P (conv-bias fold),
                                      zero rows above; columns sample-major (col = n*HW+hw)
    w1_ref    : (C_OUT_A, P_PAD) bf16 conv weight; b1 in col P; constant-one channel at row C_OUT
    w2t_ref   : (HID_A, C_OUT_A) f32  fc1 weight^T; b2 in col C_OUT; ones-passthrough row HID
    w3t_ref   : (EMB, HID_A)     f32  fc2 weight^T; b3 in col HID
    out_ref   : (EMB, 2N)        f32  embeddings, feature-major (transposed in the wrapper)
    """
    two_n = out_ref.shape[1]

    # Conv + bias + ReLU: ONE lane-dense MXU matmul for the whole fused batch (bf16 in, f32 acc).
    h = jnp.dot(w1_ref[...], patch_ref[...],
                preferred_element_type=jnp.float32)            # (C_OUT_A, 2N*HW)
    h = jnp.maximum(h, 0.0)

    # Global average pool per sample. HW = 256, so sample boundaries sit exactly on 128-lane
    # tiles: each slice is an aligned lane (XLU) reduction. The constant-one channel pools to 1.
    pooled = jnp.concatenate(
        [jnp.mean(h[:, n * HW:(n + 1) * HW], axis=-1, keepdims=True)
         for n in range(two_n)],
        axis=-1)                                               # (C_OUT_A, 2N)

    # FC1 + ReLU and FC2, feature-major so no transpose is needed in-kernel; the biases ride
    # along through the folded ones-channel / ones-row.
    z = jnp.maximum(jnp.dot(w2t_ref[...], pooled,
                            preferred_element_type=jnp.float32), 0.0)    # (HID_A, 2N)
    embt = jnp.dot(w3t_ref[...], z, preferred_element_type=jnp.float32)  # (EMB, 2N)

    out_ref[...] = embt.astype(out_ref.dtype)


def _embed_pallas(patches, w1_aug, w2t_aug, w3t_aug):
    """(P_PAD, 2N*HW) patches + folded weights -> (EMB, 2N) embeddings, one kernel launch."""
    p_pad, total_cols = patches.shape
    c_out_a = w1_aug.shape[0]
    hid_a = w2t_aug.shape[0]
    emb = w3t_aug.shape[0]
    two_n = total_cols // HW

    flops = (2 * c_out_a * p_pad * total_cols       # conv matmul
             + c_out_a * total_cols                 # pooled mean
             + 2 * hid_a * c_out_a * two_n          # fc1
             + 2 * emb * hid_a * two_n)             # fc2
    bytes_accessed = (patches.size * patches.dtype.itemsize
                      + w1_aug.size * w1_aug.dtype.itemsize
                      + w2t_aug.size * w2t_aug.dtype.itemsize
                      + w3t_aug.size * w3t_aug.dtype.itemsize
                      + emb * two_n * 4)

    return pl.pallas_call(
        _siamese_kernel,
        out_shape=jax.ShapeDtypeStruct((emb, two_n), jnp.float32),
        # Gridless call: every operand is a single whole-array block resident in VMEM for the
        # single invocation -> no double-buffering / pipeline prologue (working set < 0.2 MiB,
        # far below the VMEM limit on every TPU generation).
        cost_estimate=pl.CostEstimate(flops=flops, transcendentals=0,
                                      bytes_accessed=bytes_accessed),
    )(patches, w1_aug, w2t_aug, w3t_aug)


# ------------------------------ JAX glue --------------------------------------
def _im2col_folded(x):
    """x: (2N, C_IN, H, W) f32 -> augmented bf16 patch matrix (P_PAD, 2N*HW).

    Row r < P encodes (c, di, dj) with r = c*K*K + di*K + dj (matches w1.reshape(C_OUT, P));
    row P is all-ones (conv-bias fold); rows P+1..P_PAD-1 are zero (sublane alignment).
    Columns are sample-major: col = n*HW + (h*W + w), so the in-kernel pooling slices are
    128-lane aligned. Emitted directly in the kernel's consumption layout (one XLA fusion).
    """
    n = x.shape[0]
    xp = jnp.pad(x.astype(jnp.bfloat16), ((0, 0), (0, 0), (PAD, PAD), (PAD, PAD)))
    rows = [xp[:, c, di:di + H, dj:dj + W]                      # each (2N, H, W)
            for c in range(C_IN) for di in range(K) for dj in range(K)]
    p = jnp.stack(rows, axis=0).reshape(P, n * HW)              # (36, 2N*HW)
    ones = jnp.ones((1, n * HW), jnp.bfloat16)
    zeros = jnp.zeros((P_PAD - P - 1, n * HW), jnp.bfloat16)
    return jnp.concatenate([p, ones, zeros], axis=0)            # (40, 2N*HW)


def init_params(key):
    """Raw (PyTorch-style) parameters of the shared embedding net."""
    ks = jax.random.split(key, 6)
    s = 0.1
    w1 = s * jax.random.normal(ks[0], (C_OUT, C_IN, K, K), jnp.float32)
    b1 = s * jax.random.normal(ks[1], (C_OUT,), jnp.float32)
    w2 = s * jax.random.normal(ks[2], (C_OUT, HID), jnp.float32)
    b2 = s * jax.random.normal(ks[3], (HID,), jnp.float32)
    w3 = s * jax.random.normal(ks[4], (HID, EMB), jnp.float32)
    b3 = s * jax.random.normal(ks[5], (EMB,), jnp.float32)
    return (w1, b1, w2, b2, w3, b3)


def fold_params(params):
    """One-time fold of all biases into the weights (ones-row / ones-channel trick) and
    pre-transposition of the FC weights, so the kernel is three plain matmuls."""
    w1, b1, w2, b2, w3, b3 = params
    # Conv: (C_OUT_A, P_PAD); col P carries b1; row C_OUT is a constant-one output channel.
    w1_aug = jnp.zeros((C_OUT_A, P_PAD), jnp.float32)
    w1_aug = w1_aug.at[:C_OUT, :P].set(w1.reshape(C_OUT, P))
    w1_aug = w1_aug.at[:C_OUT, P].set(b1)
    w1_aug = w1_aug.at[C_OUT, P].set(1.0)
    # FC1^T: (HID_A, C_OUT_A); col C_OUT carries b2; row HID forwards the ones-channel.
    w2t_aug = jnp.zeros((HID_A, C_OUT_A), jnp.float32)
    w2t_aug = w2t_aug.at[:HID, :C_OUT].set(w2.T)
    w2t_aug = w2t_aug.at[:HID, C_OUT].set(b2)
    w2t_aug = w2t_aug.at[HID, C_OUT].set(1.0)
    # FC2^T: (EMB, HID_A); col HID carries b3.
    w3t_aug = jnp.zeros((EMB, HID_A), jnp.float32)
    w3t_aug = w3t_aug.at[:, :HID].set(w3.T)
    w3t_aug = w3t_aug.at[:, HID].set(b3)
    return (w1_aug.astype(jnp.bfloat16), w2t_aug, w3t_aug)


@jax.jit
def siamese_net(x1, x2, folded_params):
    """SiameseNet.forward: returns (embed(x1), embed(x2)) with a SHARED embedding net.

    Both inputs are fused into one batch, im2col'd once directly into the kernel layout,
    embedded by a single Pallas launch, and split back into the two outputs.
    """
    n = x1.shape[0]
    x = jnp.concatenate([x1, x2], axis=0)                      # (2N, C, H, W)
    patches = _im2col_folded(x)                                # (P_PAD, 2N*HW)
    embt = _embed_pallas(patches, *folded_params)              # (EMB, 2N)
    emb = embt.T                                               # (2N, EMB) -- tiny wrapper transpose
    return emb[:n], emb[n:]


def _embed_ref(x, params):
    """Plain-JAX f32 reference of the embedding net, for the correctness check."""
    w1, b1, w2, b2, w3, b3 = params
    n = x.shape[0]
    xp = jnp.pad(x, ((0, 0), (0, 0), (PAD, PAD), (PAD, PAD)))
    cols = [xp[:, :, di:di + H, dj:dj + W] for di in range(K) for dj in range(K)]
    p = jnp.stack(cols, axis=2).reshape(n, P, HW)                           # (N, 36, 256)
    h = jnp.einsum("cp,nph->nch", w1.reshape(C_OUT, P), p) + b1[None, :, None]
    h = jnp.maximum(h, 0.0)
    pooled = jnp.mean(h, axis=-1)                                           # (N, C_OUT)
    z = jnp.maximum(pooled @ w2 + b2[None], 0.0)
    return z @ w3 + b3[None]


if __name__ == "__main__":
    key = jax.random.PRNGKey(0)
    k1, k2, kp = jax.random.split(key, 3)
    x1 = jax.random.normal(k1, (N_BATCH, C_IN, H, W), jnp.float32)
    x2 = jax.random.normal(k2, (N_BATCH, C_IN, H, W), jnp.float32)
    params = init_params(kp)
    folded = fold_params(params)        # shared weights, folded once

    out1, out2 = siamese_net(x1, x2, folded)
    jax.block_until_ready((out1, out2))

    ref1 = _embed_ref(x1, params)
    ref2 = _embed_ref(x2, params)
    assert out1.shape == (N_BATCH, EMB) and out2.shape == (N_BATCH, EMB)
    # Tolerance relaxed (vs. the old 1e-4) because the conv MXU operands are bf16 with f32
    # accumulation, per the perf review; observed error is ~1e-3 on O(0.1) outputs.
    assert jnp.allclose(out1, ref1, atol=1e-2, rtol=1e-2)
    assert jnp.allclose(out2, ref2, atol=1e-2, rtol=1e-2)

    print("KERNEL_OK")
</pallas_src>

<mosaic_0001>
module attributes {stable_mosaic.version = 11 : i64} {
  func.func @_siamese_kernel(%arg0: memref<40x1024xbf16, #tpu.memory_space<vmem>>, %arg1: memref<17x40xbf16, #tpu.memory_space<vmem>>, %arg2: memref<33x17xf32, #tpu.memory_space<vmem>>, %arg3: memref<8x33xf32, #tpu.memory_space<vmem>>, %arg4: memref<8x4xf32, #tpu.memory_space<vmem>>) attributes {dimension_semantics = [], scalar_prefetch = 0 : i64, scratch_operands = 0 : i64, tpu.core_type = #tpu.core_type<tc>} {
    %c0 = arith.constant 0 : index
    %c0_0 = arith.constant 0 : index
    %0 = vector.load %arg1[%c0, %c0_0] : memref<17x40xbf16, #tpu.memory_space<vmem>>, vector<17x40xbf16>
    %c0_1 = arith.constant 0 : index
    %c0_2 = arith.constant 0 : index
    %1 = vector.load %arg0[%c0_1, %c0_2] : memref<40x1024xbf16, #tpu.memory_space<vmem>>, vector<40x1024xbf16>
    %cst = arith.constant dense<0.000000e+00> : vector<17x1024xf32>
    %2 = tpu.matmul %0, %1, %cst {dimension_numbers = #tpu.dot_dimension_numbers<[1], [0], [0], [1], [0, 0, 1, 1], [], []>} : vector<17x40xbf16>, vector<40x1024xbf16>, vector<17x1024xf32> -> vector<17x1024xf32>
    %cst_3 = arith.constant 0.000000e+00 : f32
    %3 = vector.broadcast %cst_3 : f32 to vector<17x1024xf32>
    %4 = arith.maximumf %2, %3 : vector<17x1024xf32>
    %5 = vector.extract_strided_slice %4 {offsets = [0, 0], sizes = [17, 256], strides = [1, 1]} : vector<17x1024xf32> to vector<17x256xf32>
    %cst_4 = arith.constant dense<0.000000e+00> : vector<17xf32>
    %6 = vector.multi_reduction <add>, %5, %cst_4 [1] : vector<17x256xf32> to vector<17xf32>
    %7 = vector.shape_cast %6 : vector<17xf32> to vector<17x1xf32>
    %cst_5 = arith.constant 2.560000e+02 : f32
    %8 = vector.broadcast %cst_5 : f32 to vector<17x1xf32>
    %9 = arith.divf %7, %8 : vector<17x1xf32>
    %10 = vector.extract_strided_slice %4 {offsets = [0, 256], sizes = [17, 256], strides = [1, 1]} : vector<17x1024xf32> to vector<17x256xf32>
    %cst_6 = arith.constant dense<0.000000e+00> : vector<17xf32>
    %11 = vector.multi_reduction <add>, %10, %cst_6 [1] : vector<17x256xf32> to vector<17xf32>
    %12 = vector.shape_cast %11 : vector<17xf32> to vector<17x1xf32>
    %cst_7 = arith.constant 2.560000e+02 : f32
    %13 = vector.broadcast %cst_7 : f32 to vector<17x1xf32>
    %14 = arith.divf %12, %13 : vector<17x1xf32>
    %15 = vector.extract_strided_slice %4 {offsets = [0, 512], sizes = [17, 256], strides = [1, 1]} : vector<17x1024xf32> to vector<17x256xf32>
    %cst_8 = arith.constant dense<0.000000e+00> : vector<17xf32>
    %16 = vector.multi_reduction <add>, %15, %cst_8 [1] : vector<17x256xf32> to vector<17xf32>
    %17 = vector.shape_cast %16 : vector<17xf32> to vector<17x1xf32>
    %cst_9 = arith.constant 2.560000e+02 : f32
    %18 = vector.broadcast %cst_9 : f32 to vector<17x1xf32>
    %19 = arith.divf %17, %18 : vector<17x1xf32>
    %20 = vector.extract_strided_slice %4 {offsets = [0, 768], sizes = [17, 256], strides = [1, 1]} : vector<17x1024xf32> to vector<17x256xf32>
    %cst_10 = arith.constant dense<0.000000e+00> : vector<17xf32>
    %21 = vector.multi_reduction <add>, %20, %cst_10 [1] : vector<17x256xf32> to vector<17xf32>
    %22 = vector.shape_cast %21 : vector<17xf32> to vector<17x1xf32>
    %cst_11 = arith.constant 2.560000e+02 : f32
    %23 = vector.broadcast %cst_11 : f32 to vector<17x1xf32>
    %24 = arith.divf %22, %23 : vector<17x1xf32>
    %25 = tpu.concatenate %9, %14, %19, %24 in 1 : vector<17x1xf32>, vector<17x1xf32>, vector<17x1xf32>, vector<17x1xf32> -> vector<17x4xf32>
    %c0_12 = arith.constant 0 : index
    %c0_13 = arith.constant 0 : index
    %26 = vector.load %arg2[%c0_12, %c0_13] : memref<33x17xf32, #tpu.memory_space<vmem>>, vector<33x17xf32>
    %cst_14 = arith.constant dense<0.000000e+00> : vector<33x4xf32>
    %27 = tpu.matmul %26, %25, %cst_14 {dimension_numbers = #tpu.dot_dimension_numbers<[1], [0], [0], [1], [0, 0, 1, 1], [], []>} : vector<33x17xf32>, vector<17x4xf32>, vector<33x4xf32> -> vector<33x4xf32>
    %cst_15 = arith.constant 0.000000e+00 : f32
    %28 = vector.broadcast %cst_15 : f32 to vector<33x4xf32>
    %29 = arith.maximumf %27, %28 : vector<33x4xf32>
    %c0_16 = arith.constant 0 : index
    %c0_17 = arith.constant 0 : index
    %30 = vector.load %arg3[%c0_16, %c0_17] : memref<8x33xf32, #tpu.memory_space<vmem>>, vector<8x33xf32>
    %cst_18 = arith.constant dense<0.000000e+00> : vector<8x4xf32>
    %31 = tpu.matmul %30, %29, %cst_18 {dimension_numbers = #tpu.dot_dimension_numbers<[1], [0], [0], [1], [0, 0, 1, 1], [], []>} : vector<8x33xf32>, vector<33x4xf32>, vector<8x4xf32> -> vector<8x4xf32>
    %c0_19 = arith.constant 0 : index
    %c0_20 = arith.constant 0 : index
    %32 = vector.load %arg4[%c0_19, %c0_20] : memref<8x4xf32, #tpu.memory_space<vmem>>, vector<8x4xf32>
    tpu.vector_store %arg4[%c0_19, %c0_20], %31 {strides = array<i32>} : memref<8x4xf32, #tpu.memory_space<vmem>>, vector<8x4xf32>,
    return
  }
}

</mosaic_0001>

<bundles_post_ra>
// kernel: siamese_net.1
= control target key start
LH: loop header
LB: loop body
LE: loop exit
PB: predicated region body
PF: predicated region fallthrough
CT: control target
= control target key end

     0   :  { %vm156_vm0 = vcmask 1043456   ;;  %vm149_vm1 = vcmask 326656   ;;  %vm355_vm2 = vcmask 1040384   ;;  %vm413_vm4 = vcmask 7168   ;;  %s862_s0 = inlined_call_operand.vmem [shape: bf16[40,1024], index: 0, kind: input, shape index: {}]   ;;  %s863_s1 = inlined_call_operand.vmem [shape: bf16[17,40], index: 1, kind: input, shape index: {}]   ;;  %s864_s2 = inlined_call_operand.vmem [shape: f32[33,17], index: 2, kind: input, shape index: {}]   ;;  %s865_s3 = inlined_call_operand.vmem [shape: f32[8,33], index: 3, kind: input, shape index: {}]   ;;  %s866_s4 = inlined_call_operand.vmem [shape: f32[8,4], index: 4, kind: output, shape index: {}]  }
   0x1   :  { %v37_v0 = vld [vmem:[%s862_s0 + $0x80] sm:$0xff]  ;;  %v38_v7 = vld [vmem:[%s862_s0 + $0x88] sm:$0xff]  ;;  %v39_v19 = vld [vmem:[%s862_s0 + $0x90] sm:$0xff]  ;;  %vm417_vm5 = vcmask 15360   ;;  %vm421_vm6 = vcmask 23552   ;;  %vm430_vm7 = vcmask 138240  }
   0x2   :  { %v101_v1 = vunpack.c.l.b16 %v37_v0  ;;  %v102_v2 = vunpack.c.h.b16 %v37_v0  ;;  %v558_v5 = vld [vmem:[%s862_s0 + $0x40] sm:$0xf]  ;;  %v621_v8 = vld [vmem:[%s862_s0 + $0x44] sm:$0xf]  ;;  %v103_v10 = vunpack.c.l.b16 %v38_v7  ;;  %v104_v13 = vunpack.c.h.b16 %v38_v7  ;;  %v20_v15 = vld [vmem:[%s863_s1 + $0x8] sm:$0x1] }
   0x3   :  { %v625_v6 = vld [vmem:[%s862_s0 + $0x5c] sm:$0xf0]  ;;  %v560_v9 = vld [vmem:[%s862_s0 + $0x60] sm:$0xf0]  ;;  %v105_v23 = vunpack.c.l.b16 %v39_v19  ;;  %v106_v24 = vunpack.c.h.b16 %v39_v19  ;;  %v46_v25 = vunpack.c.l.b16 %v20_v15  ;;  %v566_v28 = vld [vmem:[%s862_s0 + $0x48] sm:$0xf] }
   0x4   :  { %v125_v3 = vpack.c.b16 %v101_v1, %v101_v1  ;;  %v126_v4 = vpack.c.b16 %v102_v2, %v102_v2  ;;  %v559_v14 = vor.u32 %v625_v6, %v558_v5  ;;  %v563_v16 = vor.u32 %v621_v8, %v560_v9  ;;  %v526_v17 = vld [vmem:[%s862_s0] sm:$0xf]  ;;  %v613_v20 = vld [vmem:[%s862_s0 + $0x4] sm:$0xf]  ;;  %v626_v33 = vld [vmem:[%s862_s0 + $0x64] sm:$0xf0] }
   0x5   :  { %v617_v18 = vld [vmem:[%s862_s0 + $0x1c] sm:$0xf0]  ;;  %v528_v21 = vld [vmem:[%s862_s0 + $0x20] sm:$0xf0]  ;;  %v127_v22 = vpack.c.b16 %v103_v10, %v103_v10  ;;  %v128_v26 = vpack.c.b16 %v104_v13, %v104_v13  ;;  %v129_v29 = vpack.c.b16 %v105_v23, %v105_v23  ;;  %v130_v30 = vpack.c.b16 %v106_v24, %v106_v24  ;;  %v574_v34 = vld [vmem:[%s862_s0 + $0x50] sm:$0xf] }
   0x6   :  { %v158_v11 = vsel %vm156_vm0, %v125_v3, 0  ;;  %v161_v12 = vsel %vm156_vm0, %v126_v4, 0  ;;  %v527_v27 = vor.u32 %v617_v18, %v526_v17  ;;  %v531_v31 = vor.u32 %v613_v20, %v528_v21  ;;  %v705_v32 = vld [vmem:[%s863_s1] sm:$0xff]  ;;  %v627_v35 = vld [vmem:[%s862_s0 + $0x6c] sm:$0xf0]  ;;  %v40_v57 = vld [vmem:[%s862_s0 + $0x98] sm:$0xff] }
   0x7   :  { %186 = vmatpush.bf16.msra.mxu2 %v158_v11  ;;  %629 = vmatpush.bf16.msra.mxu3 %v158_v11  ;;  %v164_v36 = vsel %vm156_vm0, %v127_v22, 0  ;;  %v622_v37 = vld [vmem:[%s862_s0 + $0x4c] sm:$0xf]  ;;  %v170_v39 = vsel %vm156_vm0, %v129_v29, 0  ;;  %v724_v40 = vpack.c.b16 %v46_v25, %v46_v25  ;;  %v167_v41 = vsel %vm156_vm0, %v128_v26, 0 }
   0x8   :  { %204 = vmatpush.bf16.msra.mxu1 %v161_v12  ;;  %v568_v38 = vld [vmem:[%s862_s0 + $0x68] sm:$0xf0]  ;;  %258 = vmatpush.bf16.msra.mxu0 %v170_v39  ;;  %v173_v42 = vsel %vm156_vm0, %v130_v30, 0  ;;  %v623_v43 = vld [vmem:[%s862_s0 + $0x54] sm:$0xf]  ;;  %v575_v45 = vor.u32 %v627_v35, %v574_v34  ;;  %v567_v46 = vor.u32 %v626_v33, %v566_v28  ;;  %v107_v59 = vunpack.c.l.b16 %v40_v57 }
   0x9   :  { %v576_v44 = vld [vmem:[%s862_s0 + $0x70] sm:$0xf0]  ;;  %v534_v47 = vld [vmem:[%s862_s0 + $0x8] sm:$0xf]  ;;  %v542_v48 = vld [vmem:[%s862_s0 + $0x10] sm:$0xf]  ;;  %v571_v50 = vor.u32 %v622_v37, %v568_v38  ;;  %v108_v60 = vunpack.c.h.b16 %v40_v57 }
   0xa   :  { %v619_v49 = vld [vmem:[%s862_s0 + $0x2c] sm:$0xf0]  ;;  %v618_v51 = vld [vmem:[%s862_s0 + $0x24] sm:$0xf0]  ;;  %v614_v52 = vld [vmem:[%s862_s0 + $0xc] sm:$0xf]  ;;  %v579_v54 = vor.u32 %v623_v43, %v576_v44  ;;  %v131_v0 = vpack.c.b16 %v107_v59, %v107_v59 }
   0xb   :  { %187 = vmatpush.bf16.msra.mxu2 %v559_v14  ;;  %630 = vmatpush.bf16.msra.mxu3 %v559_v14  ;;  %v536_v53 = vld [vmem:[%s862_s0 + $0x28] sm:$0xf0]  ;;  %v615_v55 = vld [vmem:[%s862_s0 + $0x14] sm:$0xf]  ;;  %v543_v58 = vor.u32 %v619_v49, %v542_v48  ;;  %v535_v61 = vor.u32 %v618_v51, %v534_v47  ;;  %v132_v1 = vpack.c.b16 %v108_v60, %v108_v60  ;;  %v582_v3 = vld [vmem:[%s862_s0 + $0x58] sm:$0xf] }
   0xc   :  { %205 = vmatpush.bf16.msra.mxu1 %v563_v16  ;;  %v544_v56 = vld [vmem:[%s862_s0 + $0x30] sm:$0xf0]  ;;  %259 = vmatpush.bf16.msra.mxu0 %v575_v45  ;;  %v539_v62 = vor.u32 %v614_v52, %v536_v53  ;;  %v176_v2 = vsel %vm156_vm0, %v131_v0, 0  ;;  %v628_v4 = vld [vmem:[%s862_s0 + $0x74] sm:$0xf0]  ;;  %vm487_vm8 = vcmask 269312  }
   0xd   :  { %v547_v63 = vor.u32 %v615_v55, %v544_v56  ;;  %v179_v5 = vsel %vm156_vm0, %v132_v1, 0  ;;  %v624_v6 = vld [vmem:[%s862_s0 + $0x5c] sm:$0xf]  ;;  %v583_v8 = vor.u32 %v628_v4, %v582_v3  ;;  %v550_v10 = vld [vmem:[%s862_s0 + $0x18] sm:$0xf]  ;;  %vm514_vm9 = vcmask 31744  }
   0xe   :  { %v584_v7 = vld [vmem:[%s862_s0 + $0x78] sm:$0xf0]  ;;  %v620_v11 = vld [vmem:[%s862_s0 + $0x34] sm:$0xf0] }
   0xf   :  { %188 = vmatpush.bf16.msra.mxu2 %v527_v27  ;;  %631 = vmatpush.bf16.msra.mxu3 %v527_v27  ;;  %v587_v9 = vor.u32 %v624_v6, %v584_v7  ;;  %v616_v12 = vld [vmem:[%s862_s0 + $0x1c] sm:$0xf]  ;;  %v551_v14 = vor.u32 %v620_v11, %v550_v10 }
  0x10   :  { %206 = vmatpush.bf16.msra.mxu1 %v531_v31  ;;  %260 = vmatpush.bf16.msra.mxu0 %v543_v58  ;;  %v552_v13 = vld [vmem:[%s862_s0 + $0x38] sm:$0xf0] }
  0x11   :  { %v555_v15 = vor.u32 %v616_v12, %v552_v13 }
  0x12   :  { %588 = vmatmul.msk.bf16.vlgmr.msra.gmra.mxu2 %vm149_vm1, %v705_v32  ;;  %589 = vmatmul.msk.bf16.vlgmr.msra.gmra.mxu3 %vm149_vm1, %v724_v40 }
  0x13   :  { %222 = vmatpush.bf16.msrb.mxu2 %v164_v36  ;;  %240 = vmatpush.bf16.msrb.mxu3 %v167_v41 }
  0x14   :  { %276 = vmatpush.bf16.msrb.mxu1 %v173_v42  ;;  %596 = vmatmul.msk.bf16.vlgmr.msra.gmra.mxu0 %vm149_vm1, %v705_v32 }
  0x15   :  { %590 = vmatmul.msk.bf16.vlgmr.msra.gmra.mxu1 %vm149_vm1, %v705_v32 }
  0x17   :  { %223 = vmatpush.bf16.msrb.mxu2 %v567_v46  ;;  %241 = vmatpush.bf16.msrb.mxu3 %v571_v50 }
  0x18   :  { %277 = vmatpush.bf16.msrb.mxu1 %v579_v54 }
  0x1b   :  { %224 = vmatpush.bf16.msrb.mxu2 %v535_v61  ;;  %242 = vmatpush.bf16.msrb.mxu3 %v539_v62 }
  0x1c   :  { %278 = vmatpush.bf16.msrb.mxu1 %v547_v63 }
  0x1f   :  { %294 = vmatpush.bf16.msra.mxu2 %v176_v2  ;;  %312 = vmatpush.bf16.msra.mxu3 %v179_v5 }
  0x22   :  { %592 = vmatmul.msk.bf16.vlgmr.msrb.gmra.mxu2 %vm149_vm1, %v705_v32  ;;  %594 = vmatmul.msk.bf16.vlgmr.msrb.gmra.mxu3 %vm149_vm1, %v705_v32 }
  0x23   :  { %295 = vmatpush.bf16.msra.mxu2 %v583_v8  ;;  %313 = vmatpush.bf16.msra.mxu3 %v587_v9 }
  0x24   :  { %597 = vmatmul.msk.bf16.gmra.mxu0 %vm149_vm1, %v724_v40 }
  0x25   :  { %591 = vmatmul.msk.bf16.gmra.mxu1 %vm149_vm1, %v724_v40 }
  0x27   :  { %296 = vmatpush.bf16.msra.mxu2 %v551_v14  ;;  %314 = vmatpush.bf16.msra.mxu3 %v555_v15 }
  0x32   :  { %593 = vmatmul.msk.bf16.gmra.mxu2 %vm149_vm1, %v724_v40  ;;  %595 = vmatmul.msk.bf16.gmra.mxu3 %vm149_vm1, %v724_v40 }
  0x35   :  { %598 = vmatmul.msk.bf16.vlgmr.msrb.gmra.mxu1 %vm149_vm1, %v705_v32 }
  0x42   :  { %600 = vmatmul.msk.bf16.vlgmr.msra.gmra.mxu2 %vm149_vm1, %v705_v32  ;;  %602 = vmatmul.msk.bf16.vlgmr.msra.gmra.mxu3 %vm149_vm1, %v705_v32 }
  0x45   :  { %599 = vmatmul.msk.bf16.gmra.mxu1 %vm149_vm1, %v724_v40 }
  0x52   :  { %601 = vmatmul.msk.bf16.gmra.mxu2 %vm149_vm1, %v724_v40  ;;  %603 = vmatmul.msk.bf16.gmra.mxu3 %vm149_vm1, %v724_v40 }
  0x91   :  { %v819_v21 = vpop.f32.mrf.mxu0 }
  0x92   :  { %v208_v16 = vpop.f32.mrf.mxu1  ;;  %v329_v7 = vmax.f32 %v819_v21, 0.0 }
  0x93   :  { %v326_v17 = vmax.f32 %v208_v16, 0.0 }
  0x95   :  { %v190_v18 = vpop.f32.mrf.mxu2  ;;  %v195_v19 = vpop.f32.mrf.mxu3 }
  0x96   :  { %v325_v20 = vmax.f32 %v190_v18, 0.0  ;;  %v341_v28 = vmax.f32 %v195_v19, 0.0 }
  0x98   :  { %v349_v23 = vadd.f32 %v326_v17, %v325_v20  ;;  %v356_v33 = vsel %vm355_vm2, %v341_v28, 0.0  ;;  %v635_v28 = vmov 256.0  }
  0x99   :  { %v264_v29 = vpop.f32.mrf.mxu0  ;;  %633 = vrcp.f32 %v635_v28 }
  0x9a   :  { %v210_v22 = vpop.f32.mrf.mxu1  ;;  %350 = vadd.xlane.f32.xlu1 %v349_v23  ;;  %v337_v58 = vmax.f32 %v264_v29, 0.0 }
  0x9b   :  { %v334_v24 = vmax.f32 %v210_v22, 0.0 }
  0x9d   :  { %v192_v25 = vpop.f32.mrf.mxu2  ;;  %v197_v26 = vpop.f32.mrf.mxu3 }
  0x9e   :  { %v333_v27 = vmax.f32 %v192_v25, 0.0 }
  0xa0   :  { %v352_v31 = vadd.f32 %v334_v24, %v333_v27 }
  0xa1   :  { %v267_v40 = vpop.f32.mrf.mxu0 }
  0xa2   :  { %v213_v30 = vpop.f32.mrf.mxu1  ;;  %353 = vadd.xlane.f32.xlu1 %v352_v31  ;;  %v345_v62 = vmax.f32 %v267_v40, 0.0  ;;  %v634_v31 = vpop.eup %633 }
  0xa3   :  { %v342_v32 = vmax.f32 %v213_v30, 0.0  ;;  %vm366_vm3 = vweird.f32 %v634_v31 }
  0xa4   :  { %v391_v2 = vsel %vm355_vm2, %v345_v62, 0.0 }
  0xa5   :  { %v357_v34 = vsel %vm355_vm2, %v342_v32, 0.0  ;;  %v226_v36 = vpop.f32.mrf.mxu2  ;;  %v244_v37 = vpop.f32.mrf.mxu3  ;;  %v362_v32 = vmul.f32 256.0, %v634_v31 }
  0xa6   :  { %v358_v35 = vadd.f32 %v357_v34, %v356_v33  ;;  %v327_v38 = vmax.f32 %v226_v36, 0.0  ;;  %v328_v39 = vmax.f32 %v244_v37, 0.0 }
  0xa8   :  { %359 = vadd.xlane.f32.xlu0 %v358_v35  ;;  %v371_v42 = vadd.f32 %v328_v39, %v327_v38  ;;  %v363_v35 = vsub.f32 1.0, %v362_v32 }
  0xa9   :  { %v269_v47 = vpop.f32.mrf.mxu0 }
  0xaa   :  { %v215_v41 = vpop.f32.mrf.mxu1  ;;  %372 = vadd.xlane.f32.xlu2 %v371_v42  ;;  %v364_v37 = vmul.f32 %v634_v31, %v363_v35 }
  0xac   :  { %v365_v39 = vadd.f32 %v634_v31, %v364_v37 }
  0xad   :  { %v228_v43 = vpop.f32.mrf.mxu2  ;;  %v246_v44 = vpop.f32.mrf.mxu3 }
  0xae   :  { %v335_v45 = vmax.f32 %v228_v43, 0.0  ;;  %v336_v46 = vmax.f32 %v246_v44, 0.0  ;;  %v367_v42 = vsel %vm366_vm3, %v634_v31, %v365_v39 }
  0xb0   :  { %v374_v49 = vadd.f32 %v336_v46, %v335_v45 }
  0xb2   :  { %v280_v48 = vpop.f32.mrf.mxu1  ;;  %375 = vadd.xlane.f32.xlu2 %v374_v49 }
  0xb3   :  { %v330_v8 = vmax.f32 %v280_v48, 0.0 }
  0xb5   :  { %v231_v50 = vpop.f32.mrf.mxu2  ;;  %v249_v51 = vpop.f32.mrf.mxu3  ;;  %v385_v10 = vadd.f32 %v330_v8, %v329_v7  ;;  %v428_v7 = vld [vmem:[%s864_s2 + $0x18] sm:$0xff]  ;;  %v429_v8 = vld [vmem:[%s864_s2 + $0x20] sm:$0x1] }
  0xb6   :  { %v343_v52 = vmax.f32 %v231_v50, 0.0  ;;  %v344_v53 = vmax.f32 %v249_v51, 0.0 }
  0xb8   :  { %v377_v55 = vsel %vm355_vm2, %v343_v52, 0.0  ;;  %v378_v56 = vsel %vm355_vm2, %v344_v53, 0.0 }
  0xb9   :  { %v379_v57 = vadd.f32 %v378_v56, %v377_v55 }
  0xba   :  { %v282_v54 = vpop.f32.mrf.mxu1 }
  0xbb   :  { %v338_v59 = vmax.f32 %v282_v54, 0.0  ;;  %380 = vadd.xlane.f32.xlu0 %v379_v57 }
  0xbd   :  { %v233_v60 = vpop.f32.mrf.mxu2  ;;  %v251_v61 = vpop.f32.mrf.mxu3  ;;  %v388_v63 = vadd.f32 %v338_v59, %v337_v58 }
  0xc2   :  { %v285_v0 = vpop.f32.mrf.mxu1 }
  0xc3   :  { %v346_v1 = vmax.f32 %v285_v0, 0.0  ;;  %389 = vadd.xlane.f32.xlu0 %v388_v63 }
  0xc5   :  { %v392_v3 = vsel %vm355_vm2, %v346_v1, 0.0  ;;  %v298_v5 = vpop.f32.mrf.mxu2  ;;  %v316_v6 = vpop.f32.mrf.mxu3 }
  0xc6   :  { %v393_v4 = vadd.f32 %v392_v3, %v391_v2  ;;  %v331_v21 = vmax.f32 %v298_v5, 0.0  ;;  %v332_v24 = vmax.f32 %v316_v6, 0.0  ;;  %v425_v3 = vld [vmem:[%s864_s2] sm:$0xff]  ;;  %v426_v5 = vld [vmem:[%s864_s2 + $0x8] sm:$0xff]  ;;  %v427_v6 = vld [vmem:[%s864_s2 + $0x10] sm:$0xff] }
  0xc8   :  { %394 = vadd.xlane.f32.xlu1 %v393_v4  ;;  %v399_v27 = vadd.f32 %v332_v24, %v331_v21 }
  0xca   :  { %v287_v9 = vpop.f32.mrf.mxu1 }
  0xcd   :  { %v300_v11 = vpop.f32.mrf.mxu2  ;;  %v318_v12 = vpop.f32.mrf.mxu3 }
  0xce   :  { %v339_v13 = vmax.f32 %v300_v11, 0.0  ;;  %v340_v14 = vmax.f32 %v318_v12, 0.0 }
  0xd0   :  { %386 = vadd.xlane.f32.xlu1 %v385_v10  ;;  %v402_v15 = vadd.f32 %v340_v14, %v339_v13 }
  0xd2   :  { %403 = vadd.xlane.f32.xlu0 %v402_v15 }
  0xd5   :  { %v303_v16 = vpop.f32.mrf.mxu2  ;;  %v321_v17 = vpop.f32.mrf.mxu3 }
  0xd6   :  { %v347_v18 = vmax.f32 %v303_v16, 0.0  ;;  %v348_v19 = vmax.f32 %v321_v17, 0.0 }
  0xd8   :  { %v405_v20 = vsel %vm355_vm2, %v347_v18, 0.0  ;;  %v406_v22 = vsel %vm355_vm2, %v348_v19, 0.0  ;;  %v486_v19 = vld [vmem:[%s865_s3] sm:$0xff] }
  0xd9   :  { %v407_v23 = vadd.f32 %v406_v22, %v405_v20 }
  0xdb   :  { %408 = vadd.xlane.f32.xlu2 %v407_v23 }
  0xdd   :  { %v305_v25 = vpop.f32.mrf.mxu2  ;;  %v323_v26 = vpop.f32.mrf.mxu3 }
  0xe3   :  { %400 = vadd.xlane.f32.xlu2 %v399_v27 }
 0x10d   :  { %v351_v30 = vpop.xlane.xlu1 %350 }
 0x10e   :  { %v368_v62 = vmul.f32 %v367_v42, %v351_v30 }
 0x115   :  { %v354_v36 = vpop.xlane.xlu1 %353 }
 0x116   :  { %v369_v48 = vmul.f32 %v367_v42, %v354_v36 }
 0x11b   :  { %v360_v29 = vpop.xlane.xlu0 %359 }
 0x11c   :  { %v370_v46 = vmul.f32 %v367_v42, %v360_v29 }
 0x11d   :  { %v373_v34 = vpop.xlane.xlu2 %372 }
 0x11e   :  { %v382_v59 = vmul.f32 %v373_v34, %v367_v42 }
 0x120   :  { %v414_v1 = vsel %vm413_vm4, %v368_v62, %v382_v59 }
 0x125   :  { %v376_v40 = vpop.xlane.xlu2 %375 }
 0x126   :  { %v383_v47 = vmul.f32 %v376_v40, %v367_v42 }
 0x128   :  { %v415_v57 = vsel %vm413_vm4, %v369_v48, %v383_v47 }
 0x12e   :  { %v381_v33 = vpop.xlane.xlu0 %380 }
 0x12f   :  { %v384_v43 = vmul.f32 %v381_v33, %v367_v42 }
 0x131   :  { %v416_v51 = vsel %vm413_vm4, %v370_v46, %v384_v43 }
 0x136   :  { %v390_v38 = vpop.xlane.xlu0 %389 }
 0x137   :  { %v397_v49 = vmul.f32 %v390_v38, %v367_v42 }
 0x139   :  { %v419_v58 = vsel %vm417_vm5, %v415_v57, %v397_v49 }
 0x13b   :  { %v395_v41 = vpop.xlane.xlu1 %394 }
 0x13c   :  { %v398_v44 = vmul.f32 %v395_v41, %v367_v42 }
 0x13e   :  { %v420_v54 = vsel %vm417_vm5, %v416_v51, %v398_v44 }
 0x143   :  { %v387_v55 = vpop.xlane.xlu1 %386 }
 0x144   :  { %v396_v61 = vmul.f32 %v387_v55, %v367_v42 }
 0x145   :  { %v404_v45 = vpop.xlane.xlu0 %403 }
 0x146   :  { %v411_v52 = vmul.f32 %v404_v45, %v367_v42  ;;  %v418_v2 = vsel %vm417_vm5, %v414_v1, %v396_v61 }
 0x148   :  { %v423_v60 = vsel %vm421_vm6, %v419_v58, %v411_v52 }
 0x14e   :  { %v409_v50 = vpop.xlane.xlu2 %408 }
 0x14f   :  { %v412_v53 = vmul.f32 %v409_v50, %v367_v42 }
 0x151   :  { %v424_v56 = vsel %vm421_vm6, %v420_v54, %v412_v53 }
 0x152   :  { %604 = vmatpush.msk.msrb.mxu0 %vm355_vm2, %v424_v56 }
 0x154   :  { %463 = vmatpush.msrb.mxu0 %v423_v60 }
 0x156   :  { %v401_v63 = vpop.xlane.xlu2 %400 }
 0x157   :  { %v410_v0 = vmul.f32 %v401_v63, %v367_v42 }
 0x159   :  { %v422_v4 = vsel %vm421_vm6, %v418_v2, %v410_v0 }
 0x15a   :  { %464 = vmatpush.msrb.mxu0 %v422_v4 }
 0x15b   :  { %605 = vmatmul.msk.f32.vlgmr.msrb.gmra.mxu0 %vm430_vm7, %v425_v3 }
 0x163   :  { %606 = vmatmul.msk.f32.gmra.mxu0 %vm430_vm7, %v426_v5 }
 0x16b   :  { %607 = vmatmul.msk.f32.gmra.mxu0 %vm430_vm7, %v427_v6 }
 0x173   :  { %608 = vmatmul.msk.f32.gmra.mxu0 %vm430_vm7, %v428_v7 }
 0x17b   :  { %609 = vmatmul.msk.f32.gmra.mxu0 %vm430_vm7, %v429_v8 }
 0x1d8   :  { %v466_v9 = vpop.f32.mrf.mxu0 }
 0x1d9   :  { %v481_v18 = vmax.f32 %v466_v9, 0.0 }
 0x1e0   :  { %v469_v10 = vpop.f32.mrf.mxu0 }
 0x1e1   :  { %v482_v17 = vmax.f32 %v469_v10, 0.0 }
 0x1e8   :  { %v472_v11 = vpop.f32.mrf.mxu0 }
 0x1e9   :  { %v483_v16 = vmax.f32 %v472_v11, 0.0 }
 0x1f0   :  { %v475_v12 = vpop.f32.mrf.mxu0 }
 0x1f1   :  { %v484_v15 = vmax.f32 %v475_v12, 0.0 }
 0x1f8   :  { %v478_v13 = vpop.f32.mrf.mxu0 }
 0x1f9   :  { %v485_v14 = vmax.f32 %v478_v13, 0.0 }
 0x1fb   :  { %610 = vmatpush.msk.msra.mxu1 %vm355_vm2, %v485_v14 }
 0x1fd   :  { %506 = vmatpush.msra.mxu1 %v484_v15 }
 0x1ff   :  { %507 = vmatpush.msra.mxu1 %v483_v16 }
 0x201   :  { %508 = vmatpush.msra.mxu1 %v482_v17 }
 0x203   :  { %509 = vmatpush.msra.mxu1 %v481_v18 }
 0x204   :  { %611 = vmatmul.msk.f32.vlgmr.msra.gmra.mxu1 %vm487_vm8, %v486_v19 }
 0x281   :  { %v511_v20 = vpop.f32.mrf.mxu1 }
 0x282   :  { %515 = vst.msk [vmem:[%s866_s4] sm:$0xff] %vm514_vm9, %v511_v20 }

</bundles_post_ra>
